<compile_context>
chip_gen: v5e
topology: v5e:2x2
jax: 0.10.0
libtpu: 0.0.40
codegen_flags: <defaults>
</compile_context>

<pallas_src>
import jax
import jax.numpy as jnp
import numpy as np
from jax import lax
from jax.experimental import pallas as pl
from jax.experimental.pallas import tpu as pltpu


def _norm_reg_l1_kernel(feat_ref, target_ref, mask_ref, ind_ref, out_ref):
    # feat_ref   : VMEM (C, HW) f32 — this batch's full feature slab (lane = HW)
    # target_ref : VMEM (C, K)  f32 — lane-dense K
    # mask_ref   : VMEM (1, K)  f32 — broadcasts over C
    # ind_ref    : VMEM (1, K)  i32 — spatial indices into HW
    # out_ref    : VMEM (1, 128) f32 — lane0 = num partial, lane1 = den partial
    feat = feat_ref[...]                       # (C, HW)
    tgt = target_ref[...]                      # (C, K)
    m = mask_ref[...]                          # (1, K)
    idx = ind_ref[...]                         # (1, K) int32

    C, HW = feat.shape
    K = idx.shape[-1]

    # On-chip gather: one-hot over HW, contracted on the MXU.  HIGHEST keeps
    # the gathered values exact in f32 (one-hot entries are exact; default
    # precision could truncate feat to bf16).
    hw_iota = lax.broadcasted_iota(jnp.int32, (HW, K), 0)
    onehot = (hw_iota == idx).astype(jnp.float32)            # (HW, K)
    gathered = jnp.dot(feat, onehot,
                       preferred_element_type=jnp.float32,
                       precision=lax.Precision.HIGHEST)       # (C, K)

    # Reference: pred / (target + 1e-4), target replaced by ones, masked L1 sum.
    p = gathered / (tgt + jnp.float32(1e-4))
    num = jnp.sum(jnp.abs(p * m - m))                         # scalar
    den = jnp.sum(m) * jnp.float32(C)                         # mask expanded over C

    lane = lax.broadcasted_iota(jnp.int32, (1, 128), 1)
    out_ref[...] = jnp.where(lane == 0, num,
                             jnp.where(lane == 1, den, jnp.float32(0.0)))


@jax.jit
def norm_reg_l1_loss(output, mask, ind, target):
    """output: (B, C, H, W), mask: (B, K), ind: (B, K) int, target: (B, K, C)."""
    B, C, H, W = output.shape
    K = ind.shape[1]
    HW = H * W

    # Free reshape: NCHW -> (B, C, HW) keeps HW on the lane dim; no transpose
    # of the feature map is ever materialized.
    feat = output.reshape(B, C, HW).astype(jnp.float32)
    # Single tiny transpose so target matches the lane-dense (C, K) layout.
    tgt = jnp.transpose(target.astype(jnp.float32), (0, 2, 1))   # (B, C, K)
    mask3 = mask.astype(jnp.float32).reshape(B, 1, K)
    ind3 = ind.astype(jnp.int32).reshape(B, 1, K)

    partials = pl.pallas_call(
        _norm_reg_l1_kernel,
        out_shape=jax.ShapeDtypeStruct((B, 1, 128), jnp.float32),
        grid=(B,),
        in_specs=[
            pl.BlockSpec((None, C, HW), lambda b: (b, 0, 0)),   # feature slab
            pl.BlockSpec((None, C, K), lambda b: (b, 0, 0)),    # target
            pl.BlockSpec((None, 1, K), lambda b: (b, 0, 0)),    # mask
            pl.BlockSpec((None, 1, K), lambda b: (b, 0, 0)),    # ind
        ],
        out_specs=pl.BlockSpec((None, 1, 128), lambda b: (b, 0, 0)),
        compiler_params=pltpu.CompilerParams(
            dimension_semantics=("parallel",)),
    )(feat, tgt, mask3, ind3)

    num = jnp.sum(partials[:, 0, 0])
    den = jnp.sum(partials[:, 0, 1])
    return num / (den + jnp.float32(1e-4))


def _reference(output, mask, ind, target):
    B, C, H, W = output.shape
    feat = jnp.transpose(output, (0, 2, 3, 1)).reshape(B, H * W, C)
    pred = jax.vmap(lambda f, i: f[i])(feat, ind)                 # (B, K, C)
    m = mask.astype(jnp.float32)[:, :, None] * jnp.ones((1, 1, C), jnp.float32)
    pred = pred / (target + 1e-4)
    tgt = jnp.ones_like(target)
    loss = jnp.sum(jnp.abs(pred * m - tgt * m))
    return loss / (jnp.sum(m) + 1e-4)


if __name__ == "__main__":
    key = jax.random.PRNGKey(0)
    B, C, H, W, K = 2, 4, 16, 16, 8
    k1, k2, k3, k4 = jax.random.split(key, 4)
    output = jax.random.normal(k1, (B, C, H, W), dtype=jnp.float32)
    target = jax.random.normal(k2, (B, K, C), dtype=jnp.float32) + 2.0
    ind = jax.random.randint(k3, (B, K), 0, H * W, dtype=jnp.int32)
    mask = (jax.random.uniform(k4, (B, K)) > 0.3).astype(jnp.float32)

    loss = norm_reg_l1_loss(output, mask, ind, target)
    jax.block_until_ready(loss)

    ref = _reference(output, mask, ind, target)
    assert np.allclose(np.asarray(loss), np.asarray(ref), rtol=1e-4, atol=1e-5), (loss, ref)
    print("KERNEL_OK")
</pallas_src>

<mosaic_0001>
module attributes {stable_mosaic.version = 11 : i64} {
  func.func @_norm_reg_l1_kernel(%arg0: i32, %arg1: memref<1x4x256xf32, #tpu.memory_space<vmem>>, %arg2: memref<1x4x8xf32, #tpu.memory_space<vmem>>, %arg3: memref<1x1x8xf32, #tpu.memory_space<vmem>>, %arg4: memref<1x1x8xi32, #tpu.memory_space<vmem>>, %arg5: memref<1x1x128xf32, #tpu.memory_space<vmem>>) attributes {dimension_semantics = [#tpu.dimension_semantics<parallel>], iteration_bounds = array<i64: 2>, scalar_prefetch = 0 : i64, scratch_operands = 0 : i64, tpu.core_type = #tpu.core_type<tc>, window_params = [{transform_indices = @transform_0, window_bounds = array<i64: 1, 4, 256>}, {transform_indices = @transform_1, window_bounds = array<i64: 1, 4, 8>}, {transform_indices = @transform_2, window_bounds = array<i64: 1, 1, 8>}, {transform_indices = @transform_3, window_bounds = array<i64: 1, 1, 8>}, {transform_indices = @transform_4, window_bounds = array<i64: 1, 1, 128>}]} {
    %c0 = arith.constant 0 : index
    %c0_0 = arith.constant 0 : index
    %c0_1 = arith.constant 0 : index
    %0 = vector.load %arg1[%c0, %c0_0, %c0_1] : memref<1x4x256xf32, #tpu.memory_space<vmem>>, vector<1x4x256xf32>
    %1 = vector.shape_cast %0 : vector<1x4x256xf32> to vector<4x256xf32>
    %c0_2 = arith.constant 0 : index
    %c0_3 = arith.constant 0 : index
    %c0_4 = arith.constant 0 : index
    %2 = vector.load %arg2[%c0_2, %c0_3, %c0_4] : memref<1x4x8xf32, #tpu.memory_space<vmem>>, vector<1x4x8xf32>
    %3 = vector.shape_cast %2 : vector<1x4x8xf32> to vector<4x8xf32>
    %c0_5 = arith.constant 0 : index
    %c0_6 = arith.constant 0 : index
    %c0_7 = arith.constant 0 : index
    %4 = vector.load %arg3[%c0_5, %c0_6, %c0_7] : memref<1x1x8xf32, #tpu.memory_space<vmem>>, vector<1x1x8xf32>
    %5 = vector.shape_cast %4 : vector<1x1x8xf32> to vector<1x8xf32>
    %c0_8 = arith.constant 0 : index
    %c0_9 = arith.constant 0 : index
    %c0_10 = arith.constant 0 : index
    %6 = vector.load %arg4[%c0_8, %c0_9, %c0_10] : memref<1x1x8xi32, #tpu.memory_space<vmem>>, vector<1x1x8xi32>
    %7 = vector.shape_cast %6 : vector<1x1x8xi32> to vector<1x8xi32>
    %8 = tpu.iota {dimensions = array<i32: 0>} : vector<256x8xi32>
    %9 = vector.broadcast %7 : vector<1x8xi32> to vector<256x8xi32>
    %10 = arith.cmpi eq, %8, %9 : vector<256x8xi32>
    %11 = arith.extui %10 : vector<256x8xi1> to vector<256x8xi32>
    %12 = arith.sitofp %11 : vector<256x8xi32> to vector<256x8xf32>
    %cst = arith.constant dense<0.000000e+00> : vector<4x8xf32>
    %13 = tpu.matmul %1, %12, %cst {dimension_numbers = #tpu.dot_dimension_numbers<[1], [0], [0], [1], [0, 0, 1, 1], [], []>, precision = #tpu.contract_precision<fp32>} : vector<4x256xf32>, vector<256x8xf32>, vector<4x8xf32> -> vector<4x8xf32>
    %cst_11 = arith.constant 9.99999974E-5 : f32
    %14 = vector.broadcast %cst_11 : f32 to vector<4x8xf32>
    %15 = arith.addf %3, %14 : vector<4x8xf32>
    %16 = arith.divf %13, %15 : vector<4x8xf32>
    %17 = vector.broadcast %5 : vector<1x8xf32> to vector<4x8xf32>
    %18 = arith.mulf %16, %17 : vector<4x8xf32>
    %19 = vector.broadcast %5 : vector<1x8xf32> to vector<4x8xf32>
    %20 = arith.subf %18, %19 : vector<4x8xf32>
    %21 = math.absf %20 : vector<4x8xf32>
    %22 = vector.shape_cast %21 : vector<4x8xf32> to vector<1x4x8xf32>
    %cst_12 = arith.constant dense<0.000000e+00> : vector<1xf32>
    %23 = vector.multi_reduction <add>, %22, %cst_12 [1, 2] : vector<1x4x8xf32> to vector<1xf32>
    %24 = vector.shape_cast %23 : vector<1xf32> to vector<1x1x1xf32>
    %25 = vector.extract %24[0, 0, 0] : f32 from vector<1x1x1xf32>
    %26 = vector.shape_cast %5 : vector<1x8xf32> to vector<1x1x8xf32>
    %cst_13 = arith.constant dense<0.000000e+00> : vector<1xf32>
    %27 = vector.multi_reduction <add>, %26, %cst_13 [1, 2] : vector<1x1x8xf32> to vector<1xf32>
    %28 = vector.shape_cast %27 : vector<1xf32> to vector<1x1x1xf32>
    %29 = vector.extract %28[0, 0, 0] : f32 from vector<1x1x1xf32>
    %cst_14 = arith.constant 4.000000e+00 : f32
    %30 = arith.mulf %29, %cst_14 : f32
    %31 = tpu.iota {dimensions = array<i32: 1>} : vector<1x128xi32>
    %c0_i32 = arith.constant 0 : i32
    %32 = vector.broadcast %c0_i32 : i32 to vector<1x128xi32>
    %33 = arith.cmpi eq, %31, %32 : vector<1x128xi32>
    %c1_i32 = arith.constant 1 : i32
    %34 = vector.broadcast %c1_i32 : i32 to vector<1x128xi32>
    %35 = arith.cmpi eq, %31, %34 : vector<1x128xi32>
    %cst_15 = arith.constant 0.000000e+00 : f32
    %36 = vector.broadcast %30 : f32 to vector<1x128xf32>
    %37 = vector.broadcast %cst_15 : f32 to vector<1x128xf32>
    %38 = arith.select %35, %36, %37 : vector<1x128xi1>, vector<1x128xf32>
    %39 = vector.broadcast %25 : f32 to vector<1x128xf32>
    %40 = arith.select %33, %39, %38 : vector<1x128xi1>, vector<1x128xf32>
    %c0_16 = arith.constant 0 : index
    %c0_17 = arith.constant 0 : index
    %c0_18 = arith.constant 0 : index
    %41 = vector.load %arg5[%c0_16, %c0_17, %c0_18] : memref<1x1x128xf32, #tpu.memory_space<vmem>>, vector<1x1x128xf32>
    %42 = vector.shape_cast %41 : vector<1x1x128xf32> to vector<1x128xf32>
    %43 = vector.shape_cast %40 : vector<1x128xf32> to vector<1x1x128xf32>
    tpu.vector_store %arg5[%c0_16, %c0_17, %c0_18], %43 {strides = array<i32>} : memref<1x1x128xf32, #tpu.memory_space<vmem>>, vector<1x1x128xf32>,
    return
  }
  func.func @transform_0(%arg0: i32) -> (i32, i32, i32) {
    %c0_i32 = arith.constant 0 : i32
    %c0_i32_0 = arith.constant 0 : i32
    %c0_i32_1 = arith.constant 0 : i32
    return %arg0, %c0_i32, %c0_i32_0 : i32, i32, i32
  }
  func.func @transform_1(%arg0: i32) -> (i32, i32, i32) {
    %c0_i32 = arith.constant 0 : i32
    %c0_i32_0 = arith.constant 0 : i32
    %c0_i32_1 = arith.constant 0 : i32
    return %arg0, %c0_i32, %c0_i32_0 : i32, i32, i32
  }
  func.func @transform_2(%arg0: i32) -> (i32, i32, i32) {
    %c0_i32 = arith.constant 0 : i32
    %c0_i32_0 = arith.constant 0 : i32
    %c0_i32_1 = arith.constant 0 : i32
    return %arg0, %c0_i32, %c0_i32_0 : i32, i32, i32
  }
  func.func @transform_3(%arg0: i32) -> (i32, i32, i32) {
    %c0_i32 = arith.constant 0 : i32
    %c0_i32_0 = arith.constant 0 : i32
    %c0_i32_1 = arith.constant 0 : i32
    return %arg0, %c0_i32, %c0_i32_0 : i32, i32, i32
  }
  func.func @transform_4(%arg0: i32) -> (i32, i32, i32) {
    %c0_i32 = arith.constant 0 : i32
    %c0_i32_0 = arith.constant 0 : i32
    %c0_i32_1 = arith.constant 0 : i32
    return %arg0, %c0_i32, %c0_i32_0 : i32, i32, i32
  }
}

</mosaic_0001>

<bundles_post_ra>
// kernel: norm_reg_l1_loss.1
= control target key start
LH: loop header
LB: loop body
LE: loop exit
PB: predicated region body
PF: predicated region fallthrough
CT: control target
= control target key end

     0   :  { %s1384_s15 = smov 0   ;;  %s2426_s0 = inlined_call_operand.vmem [shape: f32[2,4,256], index: 0, kind: input, shape index: {}]   ;;  %s2427_s1 = inlined_call_operand.vmem [shape: f32[2,4,8], index: 1, kind: input, shape index: {}]   ;;  %s2428_s2 = inlined_call_operand.vmem [shape: f32[2,1,8], index: 2, kind: input, shape index: {}]   ;;  %s2429_s3 = inlined_call_operand.vmem [shape: s32[2,1,8], index: 3, kind: input, shape index: {}]   ;;  %s2430_s4 = inlined_call_operand.vmem [shape: f32[2,1,128], index: 4, kind: output, shape index: {}]  }
   0x1 LB: > { %s1192_s16 = sadd.s32 4294967295, %s1355_s15   ;;  %p1196_p0 = scmp.ge.s32.totalorder %s1355_s15, 1  ;;  %s1355_s15 = sphi %s1384_s15, %s14_s15  }
   0x2   : > { %p187_p1 = scmp.lt.s32.totalorder %s1355_s15, 3 }
   0x4   : > { %p188_p2 = pnand %p1196_p0, %p187_p1 }
   0x6   : > { %191 = sbr.rel (%p188_p2) target bundleno = 460 (0x1cc), region = 36 }
   0xb   : > { %p221_p3 = scmp.lt.s32.totalorder %s1192_s16, 1  ;;  %v2434_v0 = vlaneseq  ;;  %v2464_v13 = vmov 1.0   ;;  %v1358_v14 = vmov 0.0  }
   0xd   : > { %s2515_s16 = smov (!%p221_p3, %s1192_s16), 1  ;;  %v1395_v1 = vshrl.u32 %v2434_v0, 7 }
   0xe   : > { %s235_s19 = scalar_lea.vmem %s2429_s3, %s2515_s16  ;;  %s1330_s20 = sshll.u32 %s2515_s16, 3 }
   0xf   : > { %v1402_v2 = vadd.s32 120, %v1395_v1  ;;  %v1405_v3 = vadd.s32 112, %v1395_v1  ;;  %v1408_v4 = vadd.s32 104, %v1395_v1  ;;  %v1411_v5 = vadd.s32 96, %v1395_v1  ;;  %v1413_v6 = vld [vmem:[%s235_s19] ss:$0 sm:$0xff]  ;;  %s225_s23 = scalar_lea.vmem %s2426_s0, %s1330_s20  ;;  %s232_s30 = scalar_lea.vmem %s2428_s2, %s2515_s16 }
  0x10   : > { %v1416_v7 = vadd.s32 88, %v1395_v1  ;;  %v1419_v8 = vadd.s32 80, %v1395_v1  ;;  %v1422_v9 = vadd.s32 72, %v1395_v1  ;;  %v1425_v10 = vadd.s32 64, %v1395_v1  ;;  %v239_v56 = vld [vmem:[%s225_s23] sm:$0xff]  ;;  %s1199_s24 = sshll.u32 %s2515_s16, 2  ;;  %s238_s10 = scalar_lea.vmem %s2430_s4, %s2515_s16 }
  0x11   : > { %v1428_v11 = vadd.s32 56, %v1395_v1  ;;  %v1431_v12 = vadd.s32 48, %v1395_v1  ;;  %vm292_vm0 = vcmp.eq.s32.totalorder %v1402_v2, %v1413_v6  ;;  %vm291_vm1 = vcmp.eq.s32.totalorder %v1405_v3, %v1413_v6  ;;  %374 = vst [vmem:[#allocation1] ss:$2 sm:$0xff] %v239_v56  ;;  %s229_s27 = scalar_lea.vmem %s2427_s1, %s1199_s24 }
  0x12   : > { %vm290_vm2 = vcmp.eq.s32.totalorder %v1408_v4, %v1413_v6  ;;  %vm289_vm3 = vcmp.eq.s32.totalorder %v1411_v5, %v1413_v6  ;;  %1232 = vmatpush.msk.msra.mxu0 %vm292_vm0, %v2464_v13  ;;  %v1215_v15 = vsel %vm292_vm0, 1.0, %v1358_v14  ;;  %v1214_v16 = vsel %vm291_vm1, 1.0, %v1358_v14  ;;  %1248 = vmatpush.msk.msra.mxu3 %vm292_vm0, %v2464_v13 }
  0x13   : > { %vm288_vm4 = vcmp.eq.s32.totalorder %v1416_v7, %v1413_v6  ;;  %v1213_v17 = vsel %vm290_vm2, 1.0, %v1358_v14  ;;  %v1463_v18 = vsub.f32 %v1215_v15, %v1215_v15  ;;  %v1465_v19 = vsub.f32 %v1214_v16, %v1214_v16 }
  0x14   : > { %v1467_v20 = vsub.f32 %v1213_v17, %v1213_v17  ;;  %vm287_vm5 = vcmp.eq.s32.totalorder %v1419_v8, %v1413_v6  ;;  %1233 = vmatpush.msk.msra.mxu0 %vm291_vm1, %v2464_v13  ;;  %1249 = vmatpush.msk.msra.mxu3 %vm291_vm1, %v2464_v13  ;;  %v1212_v21 = vsel %vm289_vm3, 1.0, %v1358_v14  ;;  %vm286_vm6 = vcmp.eq.s32.totalorder %v1422_v9, %v1413_v6 }
  0x15   : > { %v1211_v22 = vsel %vm288_vm4, 1.0, %v1358_v14  ;;  %vm2454_vm7 = vcmp.eq.s32.totalorder %v1425_v10, %v1413_v6  ;;  %523 = vmatpush.msra.mxu2 %v1463_v18  ;;  %v422_v23 = vand.u32 4294901760, %v1463_v18  ;;  %v428_v24 = vand.u32 4294901760, %v1465_v19 }
  0x16   : > { %v1494_v25 = vsub.f32 %v1212_v21, %v1212_v21  ;;  %v434_v26 = vand.u32 4294901760, %v1467_v20  ;;  %1234 = vmatpush.msk.msra.mxu0 %vm290_vm2, %v2464_v13  ;;  %1250 = vmatpush.msk.msra.mxu3 %vm290_vm2, %v2464_v13  ;;  %v1505_v27 = vsub.f32 %v1211_v22, %v1211_v22  ;;  %v1210_v28 = vsel %vm287_vm5, 1.0, %v1358_v14 }
  0x17   : > { %vm2453_vm8 = vcmp.eq.s32.totalorder %v1428_v11, %v1413_v6  ;;  %v1209_v29 = vsel %vm286_vm6, 1.0, %v1358_v14  ;;  %526 = vmatpush.msra.mxu2 %v1465_v19  ;;  %v423_v30 = vsub.f32 %v1463_v18, %v422_v23  ;;  %v429_v31 = vsub.f32 %v1465_v19, %v428_v24 }
  0x18   : > { %v435_v32 = vsub.f32 %v1467_v20, %v434_v26  ;;  %v440_v33 = vand.u32 4294901760, %v1494_v25  ;;  %1235 = vmatpush.msk.msra.mxu0 %vm289_vm3, %v2464_v13  ;;  %1251 = vmatpush.msk.msra.mxu3 %vm289_vm3, %v2464_v13  ;;  %v1537_v34 = vsub.f32 %v1210_v28, %v1210_v28  ;;  %v2450_v35 = vand.u32 4294901760, %v1505_v27 }
  0x19   : > { %v1540_v36 = vsub.f32 %v1209_v29, %v1209_v29  ;;  %vm2433_vm9 = vcmp.eq.s32.totalorder %v1431_v12, %v1413_v6  ;;  %v424_v37 = vand.u32 4294901760, %v423_v30  ;;  %529 = vmatpush.msra.mxu2 %v1467_v20  ;;  %v430_v38 = vand.u32 4294901760, %v429_v31 }
  0x1a   : > { %v436_v39 = vand.u32 4294901760, %v435_v32  ;;  %v441_v40 = vsub.f32 %v1494_v25, %v440_v33  ;;  %1236 = vmatpush.msk.msra.mxu0 %vm288_vm4, %v2464_v13  ;;  %1252 = vmatpush.msk.msra.mxu3 %vm288_vm4, %v2464_v13  ;;  %v447_v41 = vsub.f32 %v1505_v27, %v2450_v35  ;;  %v2449_v42 = vand.u32 4294901760, %v1537_v34 }
  0x1b   : > { %v1208_v43 = vsel %vm2454_vm7, 1.0, %v1358_v14  ;;  %v1565_v44 = vadd.s32 40, %v1395_v1  ;;  %425 = vmatpush.msra.mxu1 %v424_v37  ;;  %532 = vmatpush.msra.mxu2 %v1494_v25  ;;  %v2448_v47 = vand.u32 4294901760, %v1540_v36  ;;  %v1207_v48 = vsel %vm2453_vm8, 1.0, %v1358_v14 }
  0x1c   : > { %v442_v45 = vand.u32 4294901760, %v441_v40  ;;  %v1571_v46 = vsub.f32 %v1208_v43, %v1208_v43  ;;  %1237 = vmatpush.msk.msra.mxu0 %vm287_vm5, %v2464_v13  ;;  %v448_v49 = vand.u32 4294901760, %v447_v41  ;;  %1253 = vmatpush.msk.msra.mxu3 %vm287_vm5, %v2464_v13  ;;  %v453_v50 = vsub.f32 %v1537_v34, %v2449_v42 }
  0x1d   : > { %vm2432_vm10 = vcmp.eq.s32.totalorder %v1565_v44, %v1413_v6  ;;  %v1591_v51 = vsub.f32 %v1207_v48, %v1207_v48  ;;  %431 = vmatpush.msra.mxu1 %v430_v38  ;;  %535 = vmatpush.msra.mxu2 %v1505_v27  ;;  %v459_v52 = vsub.f32 %v1540_v36, %v2448_v47  ;;  %v1598_v53 = vadd.s32 32, %v1395_v1 }
  0x1e   : > { %v2445_v54 = vand.u32 4294901760, %v1571_v46  ;;  %v1206_v55 = vsel %vm2433_vm9, 1.0, %v1358_v14  ;;  %1238 = vmatpush.msk.msra.mxu0 %vm286_vm6, %v2464_v13  ;;  %v454_v57 = vand.u32 4294901760, %v453_v50  ;;  %1254 = vmatpush.msk.msra.mxu3 %vm286_vm6, %v2464_v13  ;;  %v1616_v59 = vadd.s32 24, %v1395_v1 }
  0x1f   : > { %v1613_v58 = vsub.f32 %v1206_v55, %v1206_v55  ;;  %v2443_v60 = vand.u32 4294901760, %v1591_v51  ;;  %437 = vmatpush.msra.mxu1 %v436_v39  ;;  %538 = vmatpush.msra.mxu2 %v1537_v34  ;;  %v460_v61 = vand.u32 4294901760, %v459_v52  ;;  %vm2431_vm11 = vcmp.eq.s32.totalorder %v1598_v53, %v1413_v6 }
  0x20   : > { %v465_v62 = vsub.f32 %v1571_v46, %v2445_v54  ;;  %v1205_v63 = vsel %vm2432_vm10, 1.0, %v1358_v14  ;;  %1239 = vmatpush.msk.msra.mxu0 %vm2454_vm7, %v2464_v13  ;;  %1255 = vmatpush.msk.msra.mxu3 %vm2454_vm7, %v2464_v13  ;;  %vm2447_vm12 = vcmp.eq.s32.totalorder %v1616_v59, %v1413_v6  ;;  %v1647_v17 = vadd.s32 16, %v1395_v1 }
  0x21   : > { %v1642_v15 = vsub.f32 %v1591_v51, %v2443_v60  ;;  %v1644_v16 = vsub.f32 %v1205_v63, %v1205_v63  ;;  %443 = vmatpush.msra.mxu1 %v442_v45  ;;  %541 = vmatpush.msra.mxu2 %v1540_v36  ;;  %v2442_v22 = vand.u32 4294901760, %v1613_v58  ;;  %v1204_v28 = vsel %vm2431_vm11, 1.0, %v1358_v14 }
  0x22   : > { %v466_v21 = vand.u32 4294901760, %v465_v62  ;;  %v1656_v29 = vadd.s32 8, %v1395_v1  ;;  %1240 = vmatpush.msk.msra.mxu0 %vm2453_vm8, %v2464_v13  ;;  %1256 = vmatpush.msk.msra.mxu3 %vm2453_vm8, %v2464_v13  ;;  %vm2441_vm13 = vcmp.eq.s32.totalorder %v1647_v17, %v1413_v6  ;;  %v1669_v31 = vsub.f32 %v1204_v28, %v1204_v28 }
  0x23   : > { %v472_v30 = vand.u32 4294901760, %v1642_v15  ;;  %v2440_v32 = vand.u32 4294901760, %v1644_v16  ;;  %449 = vmatpush.msra.mxu1 %v448_v49  ;;  %544 = vmatpush.msra.mxu2 %v1571_v46  ;;  %v477_v37 = vsub.f32 %v1613_v58, %v2442_v22  ;;  %v1203_v38 = vsel %vm2447_vm12, 1.0, %v1358_v14 }
  0x24   : > { %vm2444_vm14 = vcmp.eq.s32.totalorder %v1656_v29, %v1413_v6  ;;  %vm2452_vm15 = vcmp.eq.s32.totalorder %v1395_v1, %v1413_v6  ;;  %1241 = vmatpush.msk.msra.mxu0 %vm2433_vm9, %v2464_v13  ;;  %1257 = vmatpush.msk.msra.mxu3 %vm2433_vm9, %v2464_v13  ;;  %v1697_v40 = vsub.f32 %v1203_v38, %v1203_v38  ;;  %v2439_v41 = vand.u32 4294901760, %v1669_v31 }
  0x25   : > { %v1695_v39 = vsub.f32 %v1644_v16, %v2440_v32  ;;  %v1202_v43 = vsel %vm2441_vm13, 1.0, %v1358_v14  ;;  %455 = vmatpush.msra.mxu1 %v454_v57  ;;  %547 = vmatpush.msra.mxu2 %v1591_v51  ;;  %v478_v45 = vand.u32 4294901760, %v477_v37  ;;  %v1201_v49 = vsel %vm2444_vm14, 1.0, %v1358_v14 }
  0x26   : > { %v1705_v48 = vsub.f32 %v1202_v43, %v1202_v43  ;;  %v1200_v50 = vsel %vm2452_vm15, 1.0, %v1358_v14  ;;  %1242 = vmatpush.msk.msra.mxu0 %vm2432_vm10, %v2464_v13  ;;  %1258 = vmatpush.msk.msra.mxu3 %vm2432_vm10, %v2464_v13  ;;  %v1727_v55 = vsub.f32 %v1669_v31, %v2439_v41  ;;  %v2438_v56 = vand.u32 4294901760, %v1697_v40 }
  0x27   : > { %v484_v52 = vand.u32 4294901760, %v1695_v39  ;;  %v1730_v57 = vsub.f32 %v1201_v49, %v1201_v49  ;;  %461 = vmatpush.msra.mxu1 %v460_v61  ;;  %550 = vmatpush.msra.mxu2 %v1613_v58  ;;  %v1734_v63 = vsub.f32 %v1200_v50, %v1200_v50  ;;  %v1737_v15 = vadd.s32 248, %v1395_v1 }
  0x28   : > { %v2435_v62 = vand.u32 4294901760, %v1705_v48  ;;  %v1740_v28 = vadd.s32 240, %v1395_v1  ;;  %1243 = vmatpush.msk.msra.mxu0 %vm2431_vm11, %v2464_v13  ;;  %1259 = vmatpush.msk.msra.mxu3 %vm2431_vm11, %v2464_v13  ;;  %v490_v61 = vand.u32 4294901760, %v1727_v55  ;;  %v495_v37 = vsub.f32 %v1697_v40, %v2438_v56 }
  0x29   : > { %v2436_v38 = vand.u32 4294901760, %v1730_v57  ;;  %v1756_v39 = vadd.s32 232, %v1395_v1  ;;  %467 = vmatpush.msra.mxu1 %v466_v21  ;;  %553 = vmatpush.msra.mxu2 %v1644_v16  ;;  %vm2456_vm11 = vcmp.eq.s32.totalorder %v1737_v15, %v1413_v6  ;;  %v2437_v49 = vand.u32 4294901760, %v1734_v63 }
  0x2a   : > { %v1762_v43 = vsub.f32 %v1705_v48, %v2435_v62  ;;  %vm2460_vm10 = vcmp.eq.s32.totalorder %v1740_v28, %v1413_v6  ;;  %1244 = vmatpush.msk.msra.mxu0 %vm2447_vm12, %v2464_v13  ;;  %1260 = vmatpush.msk.msra.mxu3 %vm2447_vm12, %v2464_v13  ;;  %v496_v21 = vand.u32 4294901760, %v495_v37  ;;  %v1231_v55 = vsel %vm2456_vm11, 1.0, %v1358_v14 }
  0x2b   : > { %v1780_v50 = vsub.f32 %v1730_v57, %v2436_v38  ;;  %vm2461_vm9 = vcmp.eq.s32.totalorder %v1756_v39, %v1413_v6  ;;  %473 = vmatpush.msra.mxu1 %v472_v30  ;;  %556 = vmatpush.msra.mxu2 %v1669_v31  ;;  %v1790_v62 = vsub.f32 %v1231_v55, %v1231_v55  ;;  %v1230_v38 = vsel %vm2460_vm10, 1.0, %v1358_v14 }
  0x2c   : > { %v502_v0 = vand.u32 4294901760, %v1762_v43  ;;  %v1795_v37 = vsub.f32 %v1734_v63, %v2437_v49  ;;  %1245 = vmatpush.msk.msra.mxu0 %vm2441_vm13, %v2464_v13  ;;  %1261 = vmatpush.msk.msra.mxu3 %vm2441_vm13, %v2464_v13  ;;  %v1810_v43 = vsub.f32 %v1230_v38, %v1230_v38  ;;  %v1813_v55 = vadd.s32 224, %v1395_v1 }
  0x2d   : > { %v508_v30 = vand.u32 4294901760, %v1780_v50  ;;  %v1229_v49 = vsel %vm2461_vm9, 1.0, %v1358_v14  ;;  %479 = vmatpush.msra.mxu1 %v478_v45  ;;  %559 = vmatpush.msra.mxu2 %v1697_v40  ;;  %v2446_v56 = vand.u32 4294901760, %v1790_v62  ;;  %v1825_v38 = vadd.s32 216, %v1395_v1 }
  0x2e   : > { %v1822_v32 = vsub.f32 %v1229_v49, %v1229_v49  ;;  %1246 = vmatpush.msk.msra.mxu0 %vm2444_vm14, %v2464_v13  ;;  %1262 = vmatpush.msk.msra.mxu3 %vm2444_vm14, %v2464_v13  ;;  %v2451_v45 = vand.u32 4294901760, %v1810_v43  ;;  %vm305_vm13 = vcmp.eq.s32.totalorder %v1813_v55, %v1413_v6  ;;  %v1839_v49 = vadd.s32 208, %v1395_v1 }
  0x2f   : > { %v1842_v50 = vadd.s32 200, %v1395_v1  ;;  %485 = vmatpush.msra.mxu1 %v484_v52  ;;  %562 = vmatpush.msra.mxu2 %v1705_v48  ;;  %v764_v22 = vsub.f32 %v1790_v62, %v2446_v56  ;;  %vm304_vm14 = vcmp.eq.s32.totalorder %v1825_v38, %v1413_v6  ;;  %v1228_v54 = vsel %vm305_vm13, 1.0, %v1358_v14 }
  0x30   : > { %v2463_v60 = vand.u32 4294901760, %v1822_v32  ;;  %1247 = vmatpush.msk.msra.mxu0 %vm2452_vm15, %v2464_v13  ;;  %1263 = vmatpush.msk.msra.mxu3 %vm2452_vm15, %v2464_v13  ;;  %v770_v52 = vsub.f32 %v1810_v43, %v2451_v45  ;;  %v1866_v56 = vsub.f32 %v1228_v54, %v1228_v54  ;;  %vm303_vm12 = vcmp.eq.s32.totalorder %v1839_v49, %v1413_v6 }
  0x31   : > { %v1227_v47 = vsel %vm304_vm14, 1.0, %v1358_v14  ;;  %491 = vmatpush.msra.mxu1 %v490_v61  ;;  %v765_v42 = vand.u32 4294901760, %v764_v22  ;;  %vm302_vm15 = vcmp.eq.s32.totalorder %v1842_v50, %v1413_v6  ;;  %565 = vmatpush.msra.mxu2 %v1730_v57  ;;  %v1226_v18 = vsel %vm303_vm12, 1.0, %v1358_v14 }
  0x32   : > { %617 = vmatpush.msrb.mxu0 %v422_v23  ;;  %v776_v35 = vsub.f32 %v1822_v32, %v2463_v60  ;;  %v1879_v45 = vsub.f32 %v1227_v47, %v1227_v47  ;;  %v771_v54 = vand.u32 4294901760, %v770_v52  ;;  %v2458_v41 = vand.u32 4294901760, %v1866_v56 }
  0x33   : > { %v1890_v23 = vadd.s32 192, %v1395_v1  ;;  %497 = vmatpush.msra.mxu1 %v496_v21  ;;  %v1895_v61 = vsub.f32 %v1226_v18, %v1226_v18  ;;  %v1225_v52 = vsel %vm302_vm15, 1.0, %v1358_v14  ;;  %568 = vmatpush.msra.mxu2 %v1734_v63  ;;  %v2475_v3 = vand.u32 4294901760, %v1540_v36 }
  0x34   : > { %621 = vmatpush.msrb.mxu0 %v428_v24  ;;  %v777_v47 = vand.u32 4294901760, %v776_v35  ;;  %v2455_v22 = vand.u32 4294901760, %v1879_v45  ;;  %766 = vmatpush.msrb.mxu3 %v765_v42  ;;  %v782_v21 = vsub.f32 %v1866_v56, %v2458_v41  ;;  %v1907_v19 = vsub.f32 %v1225_v52, %v1225_v52 }
  0x35   : > { %vm301_vm8 = vcmp.eq.s32.totalorder %v1890_v23, %v1413_v6  ;;  %v1910_v24 = vadd.s32 184, %v1395_v1  ;;  %503 = vmatpush.msra.mxu1 %v502_v0  ;;  %v2457_v42 = vand.u32 4294901760, %v1895_v61  ;;  %v1923_v52 = vadd.s32 176, %v1395_v1  ;;  %1280 = vmatpush.msk.msrb.mxu2 %vm2456_vm11, %v2464_v13 }
  0x36   : > { %625 = vmatpush.msrb.mxu0 %v434_v26  ;;  %v788_v35 = vsub.f32 %v1879_v45, %v2455_v22  ;;  %v1224_v18 = vsel %vm301_vm8, 1.0, %v1358_v14  ;;  %772 = vmatpush.msrb.mxu3 %v771_v54  ;;  %v2459_v0 = vand.u32 4294901760, %v1907_v19  ;;  %v783_v26 = vand.u32 4294901760, %v782_v21 }
  0x37   : > { %vm300_vm7 = vcmp.eq.s32.totalorder %v1910_v24, %v1413_v6  ;;  %v1932_v20 = vsub.f32 %v1224_v18, %v1224_v18  ;;  %509 = vmatpush.msra.mxu1 %v508_v30  ;;  %v794_v22 = vsub.f32 %v1895_v61, %v2457_v42  ;;  %vm299_vm11 = vcmp.eq.s32.totalorder %v1923_v52, %v1413_v6 }
  0x38   : > { %629 = vmatpush.msrb.mxu0 %v440_v33  ;;  %v1223_v54 = vsel %vm300_vm7, 1.0, %v1358_v14  ;;  %1281 = vmatpush.msk.msrb.mxu2 %vm2460_vm10, %v2464_v13  ;;  %v800_v25 = vsub.f32 %v1907_v19, %v2459_v0  ;;  %v1956_v21 = vadd.s32 168, %v1395_v1  ;;  %v2472_v18 = vand.u32 4294901760, %v1795_v37 }
  0x39   : > { %778 = vmatpush.msrb.mxu3 %v777_v47  ;;  %v2462_v33 = vand.u32 4294901760, %v1932_v20  ;;  %v1953_v30 = vsub.f32 %v1223_v54, %v1223_v54  ;;  %v2473_v42 = vand.u32 4294901760, %v1505_v27  ;;  %v789_v41 = vand.u32 4294901760, %v788_v35 }
  0x3a   : > { %515 = vmatpush.msra.mxu1 %v2472_v18  ;;  %v1222_v47 = vsel %vm299_vm11, 1.0, %v1358_v14  ;;  %v1967_v0 = vadd.s32 160, %v1395_v1  ;;  %v1970_v54 = vadd.s32 152, %v1395_v1  ;;  %1282 = vmatpush.msk.msrb.mxu2 %vm2461_vm9, %v2464_v13  ;;  %v795_v27 = vand.u32 4294901760, %v794_v22 }
  0x3b   : > { %2471 = vst [vmem:[#allocation2_spill] sm:$0xff] %v1953_v30  ;;  %633 = vmatpush.msrb.mxu0 %v2473_v42  ;;  %v806_v37 = vsub.f32 %v1932_v20, %v2462_v33  ;;  %v2466_v35 = vand.u32 4294901760, %v1953_v30  ;;  %vm298_vm10 = vcmp.eq.s32.totalorder %v1956_v21, %v1413_v6  ;;  %v375_v42 = vld.sshfl [vmem:[#allocation1] sm:$0xff pattern:$0x75316420]  ;;  %v2474_v18 = vand.u32 4294901760, %v1537_v34  ;;  %784 = vmatpush.msrb.mxu3 %v783_v26 }
  0x3c   : > { %1264 = vmatpush.msk.msrb.mxu1 %vm292_vm0, %v2464_v13  ;;  %v1988_v2 = vsub.f32 %v1222_v47, %v1222_v47  ;;  %vm297_vm0 = vcmp.eq.s32.totalorder %v1967_v0, %v1413_v6  ;;  %v1221_v22 = vsel %vm298_vm10, 1.0, %v1358_v14  ;;  %vm296_vm9 = vcmp.eq.s32.totalorder %v1970_v54, %v1413_v6  ;;  %1283 = vmatpush.msk.msrb.mxu2 %vm305_vm13, %v2464_v13 }
  0x3d   : > { %637 = vmatpush.msrb.mxu0 %v2474_v18  ;;  %v801_v34 = vand.u32 4294901760, %v800_v25  ;;  %v812_v26 = vsub.f32 %v1953_v30, %v2466_v35  ;;  %v2009_v47 = vsub.f32 %v1221_v22, %v1221_v22  ;;  %v1220_v18 = vsel %vm297_vm0, 1.0, %v1358_v14  ;;  %790 = vmatpush.msrb.mxu3 %v789_v41 }
  0x3e   : > { %1265 = vmatpush.msk.msrb.mxu1 %vm291_vm1, %v2464_v13  ;;  %v2469_v33 = vand.u32 4294901760, %v1988_v2  ;;  %v2018_v60 = vsub.f32 %v1220_v18, %v1220_v18  ;;  %v2020_v25 = vand.u32 4294901760, %v375_v42  ;;  %v2023_v13 = vadd.s32 144, %v1395_v1 }
  0x3f   : > { %641 = vmatpush.msrb.mxu0 %v2475_v3  ;;  %v2476_v22 = vmov 1.0   ;;  %v823_v36 = vand.u32 4294901760, %v2009_v47  ;;  %v1219_v41 = vsel %vm296_vm9, 1.0, %v1358_v14  ;;  %v2039_v18 = vadd.s32 136, %v1395_v1  ;;  %796 = vmatpush.msrb.mxu3 %v795_v27 }
  0x40   : > { %1266 = vmatpush.msk.msrb.mxu1 %vm290_vm2, %v2476_v22  ;;  %1284 = vmatpush.msk.msrb.mxu2 %vm304_vm14, %v2476_v22  ;;  %v2477_v3 = vand.u32 4294901760, %v1571_v46  ;;  %v807_v4 = vand.u32 4294901760, %v806_v37  ;;  %v818_v35 = vsub.f32 %v1988_v2, %v2469_v33  ;;  %v2470_v30 = vand.u32 4294901760, %v2018_v60 }
  0x41   : > { %vm295_vm1 = vcmp.eq.s32.totalorder %v2023_v13, %v1413_v6  ;;  %v2058_v46 = vsub.f32 %v375_v42, %v2020_v25  ;;  %v2060_v27 = vsub.f32 %v1219_v41, %v1219_v41  ;;  %vm294_vm2 = vcmp.eq.s32.totalorder %v2039_v18, %v1413_v6  ;;  %802 = vmatpush.msrb.mxu3 %v801_v34 }
  0x42   : > { %645 = vmatpush.msrb.mxu0 %v2477_v3  ;;  %1267 = vmatpush.msk.msrb.mxu1 %vm289_vm3, %v2476_v22  ;;  %v1218_v37 = vsel %vm295_vm1, 1.0, %v1358_v14  ;;  %v2478_v5 = vand.u32 4294901760, %v1591_v51  ;;  %v813_v3 = vand.u32 4294901760, %v812_v26  ;;  %v824_v42 = vsub.f32 %v2009_v47, %v823_v36 }
  0x43   : > { %1285 = vmatpush.msk.msrb.mxu2 %vm303_vm12, %v2476_v22  ;;  %v2073_v33 = vsub.f32 %v1218_v37, %v1218_v37  ;;  %v835_v51 = vand.u32 4294901760, %v2060_v27  ;;  %v2085_v34 = vadd.s32 128, %v1395_v1  ;;  %v1217_v26 = vsel %vm294_vm2, 1.0, %v1358_v14  ;;  %808 = vmatpush.msrb.mxu3 %v807_v4 }
  0x44   : > { %649 = vmatpush.msrb.mxu0 %v2478_v5  ;;  %1268 = vmatpush.msk.msrb.mxu1 %vm288_vm4, %v2476_v22  ;;  %v2479_v41 = vand.u32 4294901760, %v1613_v58  ;;  %v819_v7 = vand.u32 4294901760, %v818_v35  ;;  %v830_v37 = vsub.f32 %v2018_v60, %v2470_v30  ;;  %v413_v58 = vand.u32 4294901760, %v2058_v46 }
  0x45   : > { %1286 = vmatpush.msk.msrb.mxu2 %vm302_vm15, %v2476_v22  ;;  %v841_v5 = vand.u32 4294901760, %v2073_v33  ;;  %vm293_vm3 = vcmp.eq.s32.totalorder %v2085_v34, %v1413_v6  ;;  %v2108_v35 = vsub.f32 %v1217_v26, %v1217_v26  ;;  %v2480_v4 = vand.u32 4294901760, %v1644_v16  ;;  %814 = vmatpush.msrb.mxu3 %v813_v3  ;;  %v376_v16 = vld.sshfl [vmem:[#allocation1 + $0x8] sm:$0xff pattern:$0x75316420] }
  0x46   : > { %653 = vmatpush.msrb.mxu0 %v2479_v41  ;;  %1269 = vmatpush.msk.msrb.mxu1 %vm287_vm5, %v2476_v22  ;;  %v825_v41 = vand.u32 4294901760, %v824_v42  ;;  %v836_v8 = vsub.f32 %v2060_v27, %v835_v51  ;;  %v1216_v30 = vsel %vm293_vm3, 1.0, %v1358_v14  ;;  %v2481_v3 = vand.u32 4294901760, %v1669_v31 }
  0x47   : > { %1287 = vmatpush.msk.msrb.mxu2 %vm301_vm8, %v2476_v22  ;;  %820 = vmatpush.msrb.mxu3 %v819_v7  ;;  %v831_v42 = vand.u32 4294901760, %v830_v37  ;;  %v842_v14 = vsub.f32 %v2073_v33, %v841_v5  ;;  %v2132_v26 = vsub.f32 %v1216_v30, %v1216_v30  ;;  %vm2482_vm4 = vcmp.eq.s32.totalorder %v1425_v10, %v1413_v6 }
  0x48   : > { %657 = vmatpush.msrb.mxu0 %v2480_v4  ;;  %1270 = vmatpush.msk.msrb.mxu1 %vm286_vm6, %v2476_v22  ;;  %v414_v9 = vsub.f32 %v2058_v46, %v413_v58  ;;  %v847_v31 = vand.u32 4294901760, %v2108_v35  ;;  %v2483_v7 = vand.u32 4294901760, %v1697_v40  ;;  %v837_v30 = vand.u32 4294901760, %v836_v8 }
  0x49   : > { %1288 = vmatpush.msk.msrb.mxu2 %vm300_vm7, %v2476_v22  ;;  %826 = vmatpush.msrb.mxu3 %v825_v41  ;;  %v2146_v37 = vand.u32 4294901760, %v376_v16  ;;  %vm2484_vm5 = vcmp.eq.s32.totalorder %v1428_v11, %v1413_v6  ;;  %v2485_v10 = vand.u32 4294901760, %v1705_v48  ;;  %v843_v40 = vand.u32 4294901760, %v842_v14 }
  0x4a   : > { %661 = vmatpush.msrb.mxu0 %v2481_v3  ;;  %1271 = vmatpush.msk.msrb.mxu1 %vm2482_vm4, %v2476_v22  ;;  %v853_v4 = vand.u32 4294901760, %v2132_v26  ;;  %vm2486_vm6 = vcmp.eq.s32.totalorder %v1431_v12, %v1413_v6  ;;  %v415_v11 = vand.u32 4294901760, %v414_v9  ;;  %v848_v48 = vsub.f32 %v2108_v35, %v847_v31 }
  0x4b   : > { %1289 = vmatpush.msk.msrb.mxu2 %vm299_vm11, %v2476_v22  ;;  %832 = vmatpush.msrb.mxu3 %v831_v42  ;;  %v2487_v41 = vand.u32 4294901760, %v1730_v57  ;;  %v2173_v8 = vsub.f32 %v376_v16, %v2146_v37  ;;  %vm2488_vm4 = vcmp.eq.s32.totalorder %v1565_v44, %v1413_v6  ;;  %v2489_v12 = vand.u32 4294901760, %v1734_v63 }
  0x4c   : > { %665 = vmatpush.msrb.mxu0 %v2483_v7  ;;  %1272 = vmatpush.msk.msrb.mxu1 %vm2484_vm5, %v2476_v22  ;;  %v854_v57 = vsub.f32 %v2132_v26, %v853_v4  ;;  %vm2490_vm5 = vcmp.eq.s32.totalorder %v1598_v53, %v1413_v6  ;;  %v849_v44 = vand.u32 4294901760, %v848_v48  ;;  %v2511_v55 = vand.u32 4294901760, %v1988_v2  ;;  %v1346_v7 = vld [vmem:[%s232_s30] ss:$0 sm:$0xff] }
  0x4d   : > { %1290 = vmatpush.msk.msrb.mxu2 %vm298_vm10, %v2476_v22  ;;  %838 = vmatpush.msrb.mxu3 %v837_v30  ;;  %v754_v63 = vand.u32 4294901760, %v2173_v8  ;;  %v2512_v38 = vand.u32 4294901760, %v2018_v60 }
  0x4e   : > { %669 = vmatpush.msrb.mxu0 %v2485_v10  ;;  %1273 = vmatpush.msk.msrb.mxu1 %vm2486_vm6, %v2476_v22  ;;  %vm2491_vm6 = vcmp.eq.s32.totalorder %v1616_v59, %v1413_v6  ;;  %v855_v53 = vand.u32 4294901760, %v854_v57 }
  0x4f   : > { %1291 = vmatpush.msk.msrb.mxu2 %vm297_vm0, %v2476_v22  ;;  %844 = vmatpush.msrb.mxu3 %v843_v40  ;;  %v755_v59 = vsub.f32 %v2173_v8, %v754_v63 }
  0x50   : > { %673 = vmatpush.msrb.mxu0 %v2487_v41  ;;  %1274 = vmatpush.msk.msrb.mxu1 %vm2488_vm4, %v2476_v22  ;;  %vm2492_vm4 = vcmp.eq.s32.totalorder %v1647_v17, %v1413_v6  ;;  %v2495_v17 = vand.u32 4294901760, %v1810_v43 }
  0x51   : > { %1292 = vmatpush.msk.msrb.mxu2 %vm296_vm9, %v2476_v22  ;;  %416 = vmatmul.f32.vlgmr.msra.gmra.mxu0 %v415_v11  ;;  %v241_v11 = vld [vmem:[%s232_s30] sm:$0x1] }
  0x52   : > { %677 = vmatpush.msrb.mxu0 %v2489_v12  ;;  %1275 = vmatpush.msk.msrb.mxu1 %vm2490_vm5, %v2476_v22  ;;  %vm2494_vm5 = vcmp.eq.s32.totalorder %v1656_v29, %v1413_v6  ;;  %v2499_v29 = vand.u32 4294901760, %v1822_v32 }
  0x53   : > { %1293 = vmatpush.msk.msrb.mxu2 %vm295_vm1, %v2476_v22  ;;  %850 = vmatpush.msrb.mxu3 %v849_v44 }
  0x54   : > { %864 = vmatpush.msra.mxu0 %v1790_v62  ;;  %1276 = vmatpush.msk.msrb.mxu1 %vm2491_vm6, %v2476_v22  ;;  %vm2496_vm6 = vcmp.eq.s32.totalorder %v1737_v15, %v1413_v6  ;;  %v2507_v15 = vld [vmem:[#allocation2_spill] sm:$0xff] }
  0x55   : > { %571 = vmatmul.f32.vlgmr.msra.gmra.mxu2 %v2058_v46  ;;  %610 = vmatmul.f32.vlgmr.msra.gmra.mxu3 %v413_v58  ;;  %v2493_v46 = vand.u32 4294901760, %v1790_v62  ;;  %v756_v62 = vand.u32 4294901760, %v755_v59 }
  0x56   : > { %1294 = vmatpush.msk.msrb.mxu2 %vm294_vm2, %v2476_v22  ;;  %867 = vmatpush.msra.mxu0 %v1810_v43  ;;  %v2510_v43 = vand.u32 4294901760, %v2507_v15 }
  0x57   : > { %1277 = vmatpush.msk.msrb.mxu1 %vm2492_vm4, %v2476_v22  ;;  %856 = vmatpush.msrb.mxu3 %v855_v53  ;;  %vm2497_vm4 = vcmp.eq.s32.totalorder %v1395_v1, %v1413_v6  ;;  %v2502_v1 = vand.u32 4294901760, %v1866_v56 }
  0x58   : > { %1295 = vmatpush.msk.msrb.mxu2 %vm293_vm3, %v2476_v22  ;;  %870 = vmatpush.msra.mxu0 %v1822_v32  ;;  %v2505_v32 = vand.u32 4294901760, %v1879_v45 }
  0x59   : > { %1278 = vmatpush.msk.msrb.mxu1 %vm2494_vm5, %v2476_v22  ;;  %1312 = vmatpush.msk.msra.mxu3 %vm2496_vm6, %v2476_v22  ;;  %vm2498_vm5 = vmmov %vm2496_vm6  ;;  %vm2500_vm6 = vcmp.eq.s32.totalorder %v1740_v28, %v1413_v6  ;;  %v2508_v28 = vand.u32 4294901760, %v1907_v19 }
  0x5a   : > { %958 = vmatpush.msra.mxu2 %v2493_v46  ;;  %873 = vmatpush.msra.mxu0 %v1866_v56  ;;  %v2506_v56 = vand.u32 4294901760, %v1895_v61 }
  0x5b   : > { %517 = vmatmul.f32.vlgmr.msra.gmra.mxu1 %v2020_v25  ;;  %1313 = vmatpush.msk.msra.mxu3 %vm2500_vm6, %v2476_v22 }
  0x5c   : > { %962 = vmatpush.msra.mxu2 %v2495_v17  ;;  %1279 = vmatpush.msk.msrb.mxu1 %vm2497_vm4, %v2476_v22  ;;  %vm2501_vm4 = vmmov %vm2500_vm6 }
  0x5d   : > { %876 = vmatpush.msra.mxu0 %v1879_v45  ;;  %757 = vmatmul.f32.vlgmr.msrb.gmra.mxu2 %v756_v62 }
  0x5e   : > { %1296 = vmatpush.msk.msra.mxu1 %vm2498_vm5, %v2476_v22  ;;  %966 = vmatpush.msra.mxu2 %v2499_v29  ;;  %vm2503_vm5 = vcmp.eq.s32.totalorder %v1756_v39, %v1413_v6  ;;  %v2509_v39 = vand.u32 4294901760, %v1932_v20 }
  0x5f   : > { %879 = vmatpush.msra.mxu0 %v1895_v61  ;;  %1314 = vmatpush.msk.msra.mxu3 %vm2503_vm5, %v2476_v22  ;;  %vm2504_vm6 = vmmov %vm2503_vm5 }
  0x60   : > { %1297 = vmatpush.msk.msra.mxu1 %vm2501_vm4, %v2476_v22  ;;  %970 = vmatpush.msra.mxu2 %v2502_v1 }
  0x61   : > { %882 = vmatpush.msra.mxu0 %v1907_v19  ;;  %858 = vmatmul.f32.vlgmr.msrb.gmra.mxu3 %v2146_v37 }
  0x62   : > { %679 = vmatmul.f32.vlgmr.msrb.gmra.mxu0 %v2020_v25  ;;  %1298 = vmatpush.msk.msra.mxu1 %vm2504_vm6, %v2476_v22 }
  0x63   : > { %974 = vmatpush.msra.mxu2 %v2505_v32  ;;  %1315 = vmatpush.msk.msra.mxu3 %vm305_vm13, %v2476_v22 }
  0x64   : > { %885 = vmatpush.msra.mxu0 %v1932_v20  ;;  %716 = vmatmul.f32.vlgmr.msrb.gmra.mxu1 %v2020_v25 }
  0x65   : > { %1299 = vmatpush.msk.msra.mxu1 %vm305_vm13, %v2476_v22  ;;  %978 = vmatpush.msra.mxu2 %v2506_v56  ;;  %v2513_v56 = vlaneseq }
  0x66   : > { %1316 = vmatpush.msk.msra.mxu3 %vm304_vm14, %v2476_v22  ;;  %888 = vmatpush.msra.mxu0 %v2507_v15 }
  0x67   : > { %1300 = vmatpush.msk.msra.mxu1 %vm304_vm14, %v2476_v22  ;;  %982 = vmatpush.msra.mxu2 %v2508_v28  ;;  %v1107_v15 = vand.u32 127, %v2513_v56 }
  0x68   : > { %1317 = vmatpush.msk.msra.mxu3 %vm303_vm12, %v2476_v22  ;;  %891 = vmatpush.msra.mxu0 %v1988_v2 }
  0x69   : > { %1301 = vmatpush.msk.msra.mxu1 %vm303_vm12, %v2476_v22  ;;  %986 = vmatpush.msra.mxu2 %v2509_v39  ;;  %vm1094_vm12 = vcmask 57344   ;;  %vm1109_vm13 = vcmp.eq.s32.totalorder %v1107_v15, 1  ;;  %vm1108_vm14 = vcmp.eq.s32.totalorder %v1107_v15, 0 }
  0x6a   : > { %1318 = vmatpush.msk.msra.mxu3 %vm302_vm15, %v2476_v22  ;;  %894 = vmatpush.msra.mxu0 %v2009_v47  ;;  %v1095_v48 = vsel %vm1094_vm12, %v241_v11, 0.0 }
  0x6b   : > { %1302 = vmatpush.msk.msra.mxu1 %vm302_vm15, %v2476_v22  ;;  %990 = vmatpush.msra.mxu2 %v2510_v43 }
  0x6c   : > { %1319 = vmatpush.msk.msra.mxu3 %vm301_vm8, %v2476_v22  ;;  %897 = vmatpush.msra.mxu0 %v2018_v60  ;;  %v240_v60 = vld [vmem:[%s229_s27] sm:$0xf] }
  0x6d   : > { %1303 = vmatpush.msk.msra.mxu1 %vm301_vm8, %v2476_v22  ;;  %994 = vmatpush.msra.mxu2 %v2511_v55  ;;  %v1061_v50 = vadd.f32 0.0001, %v240_v60 }
  0x6e   : > { %1320 = vmatpush.msk.msra.mxu3 %vm300_vm7, %v2476_v22  ;;  %900 = vmatpush.msra.mxu0 %v2060_v27 }
  0x6f   : > { %1304 = vmatpush.msk.msra.mxu1 %vm300_vm7, %v2476_v22  ;;  %998 = vmatpush.msra.mxu2 %v823_v36  ;;  %1347 = vrcp.f32 %v1061_v50  ;;  %vm1067_vm7 = vweird.f32 %v1061_v50  ;;  %v1073_v27 = vand.u32 2147483648, %v1061_v50  ;;  %v1071_v34 = vand.u32 2147483647, %v1061_v50 }
  0x70   : > { %1321 = vmatpush.msk.msra.mxu3 %vm299_vm11, %v2476_v22  ;;  %903 = vmatpush.msra.mxu0 %v2073_v33 }
  0x71   : > { %1305 = vmatpush.msk.msra.mxu1 %vm299_vm11, %v2476_v22  ;;  %1002 = vmatpush.msra.mxu2 %v2512_v38  ;;  %v1074_v16 = vor.u32 1.1754944e-38, %v1073_v27  ;;  %vm1083_vm11 = vcmask 60416  }
  0x72   : > { %1322 = vmatpush.msk.msra.mxu3 %vm298_vm10, %v2476_v22  ;;  %906 = vmatpush.msra.mxu0 %v2108_v35 }
  0x73   : > { %1306 = vmatpush.msk.msra.mxu1 %vm298_vm10, %v2476_v22  ;;  %1006 = vmatpush.msra.mxu2 %v835_v51  ;;  %vm1072_vm10 = vcmp.eq.f32.partialorder %v1071_v34, 8.507059e+37 }
  0x74   : > { %1323 = vmatpush.msk.msra.mxu3 %vm297_vm0, %v2476_v22  ;;  %909 = vmatpush.msra.mxu0 %v2132_v26 }
  0x75   : > { %912 = vmatmul.f32.vlgmr.msra.gmra.mxu0 %v2173_v8  ;;  %1307 = vmatpush.msk.msra.mxu1 %vm297_vm0, %v2476_v22  ;;  %v1348_v52 = vpop.eup %1347 }
  0x76   : > { %1010 = vmatpush.msra.mxu2 %v841_v5  ;;  %1324 = vmatpush.msk.msra.mxu3 %vm296_vm9, %v2476_v22  ;;  %v1063_v33 = vmul.f32 %v1348_v52, %v1061_v50  ;;  %vm1068_vm8 = vweird.f32 %v1348_v52 }
  0x77   : > { %1308 = vmatpush.msk.msra.mxu1 %vm296_vm9, %v2476_v22  ;;  %vm1069_vm9 = vmor %vm1067_vm7, %vm1068_vm8 }
  0x78   : > { %1014 = vmatpush.msra.mxu2 %v847_v31  ;;  %1325 = vmatpush.msk.msra.mxu3 %vm295_vm1, %v2476_v22  ;;  %v1064_v2 = vsub.f32 1.0, %v1063_v33 }
  0x79   : > { %1309 = vmatpush.msk.msra.mxu1 %vm295_vm1, %v2476_v22 }
  0x7a   : > { %1018 = vmatpush.msra.mxu2 %v853_v4  ;;  %1326 = vmatpush.msk.msra.mxu3 %vm294_vm2, %v2476_v22 }
  0x7b   : > { %1020 = vmatmul.f32.vlgmr.msra.gmra.mxu2 %v2146_v37  ;;  %1310 = vmatpush.msk.msra.mxu1 %vm294_vm2, %v2476_v22 }
  0x7c   : > { %1327 = vmatpush.msk.msra.mxu3 %vm293_vm3, %v2476_v22 }
  0x7d   : > { %1057 = vmatmul.f32.vlgmr.msra.gmra.mxu3 %v2146_v37  ;;  %1311 = vmatpush.msk.msra.mxu1 %vm293_vm3, %v2476_v22  ;;  %v1065_v22 = vmul.f32 %v1348_v52, %v1064_v2 }
  0x7e   : > { %951 = vmatmul.f32.vlgmr.msra.gmra.mxu1 %v754_v63 }
  0x7f   : > { %v1066_v51 = vadd.f32 %v1348_v52, %v1065_v22 }
  0x81   : > { %v1070_v3 = vsel %vm1069_vm9, %v1348_v52, %v1066_v51 }
  0x82   : > { %v1075_v9 = vsel %vm1072_vm10, %v1074_v16, %v1070_v3 }
  0xce   : > { %v417_v45 = vpop.f32.mrf.mxu0 }
  0xd8   : > { %v518_v13 = vpop.f32.mrf.mxu1  ;;  %v572_v23 = vpop.f32.mrf.mxu2 }
  0xd9   : > { %v519_v49 = vadd.f32 %v518_v13, %v417_v45  ;;  %v611_v19 = vpop.f32.mrf.mxu3 }
  0xdb   : > { %v573_v61 = vadd.f32 %v572_v23, %v519_v49 }
  0xdd   : > { %v612_v24 = vadd.f32 %v611_v19, %v573_v61 }
  0xdf   : > { %v680_v6 = vpop.f32.mrf.mxu0 }
  0xe0   : > { %v681_v0 = vadd.f32 %v680_v6, %v612_v24  ;;  %v758_v54 = vpop.f32.mrf.mxu2 }
  0xe1   : > { %v717_v20 = vpop.f32.mrf.mxu1 }
  0xe2   : > { %v718_v21 = vadd.f32 %v717_v20, %v681_v0 }
  0xe4   : > { %v759_v47 = vadd.f32 %v758_v54, %v718_v21  ;;  %v859_v25 = vpop.f32.mrf.mxu3 }
  0xe6   : > { %v860_v18 = vadd.f32 %v859_v25, %v759_v47 }
  0xf2   : > { %v913_v36 = vpop.f32.mrf.mxu0 }
  0xf3   : > { %v914_v5 = vadd.f32 %v913_v36, %v860_v18 }
  0xfb   : > { %v952_v58 = vpop.f32.mrf.mxu1 }
  0xfc   : > { %v953_v35 = vadd.f32 %v952_v58, %v914_v5 }
  0xfe   : > { %v1021_v42 = vpop.f32.mrf.mxu2 }
  0xff   : > { %v1022_v14 = vadd.f32 %v1021_v42, %v953_v35 }
 0x100   : > { %v1058_v26 = vpop.f32.mrf.mxu3 }
 0x101   : > { %v1059_v31 = vadd.f32 %v1058_v26, %v1022_v14 }
 0x103   : > { %v1076_v30 = vmul.f32 %v1075_v9, %v1059_v31 }
 0x105   : > { %v1080_v37 = vmul.f32 %v1346_v7, %v1076_v30 }
 0x107   : > { %v1081_v10 = vsub.f32 %v1080_v37, %v1346_v7 }
 0x109   : > { %v1082_v40 = vand.u32 2147483647, %v1081_v10 }
 0x10b   : > { %v1084_v4 = vsel %vm1083_vm11, %v1082_v40, 0.0 }
 0x10c   : > { %1085 = vadd.xlane.f32.xlu0 %v1084_v4 }
 0x114   : > { %1096 = vadd.xlane.f32.xlu0 %v1095_v48 }
 0x17f   : > { %v1086_v41 = vpop.xlane.xlu0 %1085 }
 0x180   : > { %v1087_v8 = vrot.slane %v1086_v41, 4 }
 0x182   : > { %v1088_v12 = vadd.f32 %v1087_v8, %v1086_v41 }
 0x184   : > { %v1089_v57 = vrot.slane %v1088_v12, 2 }
 0x186   : > { %v1090_v44 = vadd.f32 %v1089_v57, %v1088_v12 }
 0x187   : > { %v1097_v63 = vpop.xlane.xlu0 %1096 }
 0x188   : > { %v1098_v53 = vrot.slane %v1097_v63, 4  ;;  %v1091_v59 = vrot.slane %v1090_v44, 1 }
 0x18a   : > { %v1099_v46 = vadd.f32 %v1098_v53, %v1097_v63  ;;  %v1092_v17 = vadd.f32 %v1091_v59, %v1090_v44 }
 0x18c   : > { %v1100_v62 = vrot.slane %v1099_v46, 2  ;;  %1331 = vpush %v1092_v17 }
 0x18e   : > { %v1101_v29 = vadd.f32 %v1100_v62, %v1099_v46 }
 0x190   : > { %v1102_v1 = vrot.slane %v1101_v29, 1 }
 0x192   : > { %v1103_v32 = vadd.f32 %v1102_v1, %v1101_v29 }
 0x194   : > { %1333 = vpush %v1103_v32 }
 0x1bd   : > { %s1332_s5 = spop %1331 }
 0x1be   : > { %v1112_v39 = vstv %s1332_s5 }
 0x1c5   : > { %s1334_s6 = spop %1333 }
 0x1c6   : > { %s1105_s7 = smul.f32 4.0, %s1334_s6 }
 0x1c8   : > { %v1110_v28 = vstv %s1105_s7 }
 0x1c9   : > { %v1111_v43 = vsel %vm1109_vm13, %v1110_v28, 0.0 }
 0x1ca   : > { %v1113_v55 = vsel %vm1108_vm14, %v1112_v39, %v1111_v43 }
 0x1cb   : > { %1114 = vst [vmem:[%s238_s10] sm:$0x1] %v1113_v55 }
 0x1cc PF: > { %s14_s15 = sadd.s32 1, %s1355_s15  }
 0x1cd   : > { %p11_p4 = scmp.ge.s32.totalorder %s14_s15, 4  }
 0x1cf   :  { %13 = sbr.rel (!%p11_p4) target bundleno = 1 (0x1), region = 75 }

</bundles_post_ra>
